<compile_context>
chip_gen: v5e
topology: v5e:2x2
jax: 0.10.0
libtpu: 0.0.40
codegen_flags: <defaults>
</compile_context>

<pallas_src>
import jax
import jax.numpy as jnp
from jax.experimental import pallas as pl
from jax.experimental.pallas import tpu as pltpu


def _round_up(x, m):
    return ((x + m - 1) // m) * m


# ---------------------------------------------------------------------------
# Kernel body
# ---------------------------------------------------------------------------
def tower_kernel(x_ref, w1_ref, b1_ref, w2_ref, b2_ref, o_ref):
    # fc1 on the MXU in bf16 with f32 accumulation: [TB, Ip] @ [Ip, Hp]
    x = x_ref[...].astype(jnp.bfloat16)
    h = jnp.dot(x, w1_ref[...], preferred_element_type=jnp.float32)
    # bias + ReLU in f32 (v5e VPU has no bf16 path)
    h = jnp.maximum(h + b1_ref[...], 0.0)
    # dropout(p=0.4) in eval/inference mode == identity
    # fc2 on the MXU in bf16 with f32 accumulation: [TB, Hp] @ [Hp, Op]
    out = jnp.dot(h.astype(jnp.bfloat16), w2_ref[...],
                  preferred_element_type=jnp.float32)
    out = out + b2_ref[...]
    # sigmoid(x) == 0.5 * tanh(0.5 * x) + 0.5 : single exact EUP push.
    out = 0.5 * jnp.tanh(0.5 * out) + 0.5
    o_ref[...] = out.astype(o_ref.dtype)


# ---------------------------------------------------------------------------
# VMEM sizing
# ---------------------------------------------------------------------------
def _vmem_budget_bytes():
    """~75% of this generation's per-core VMEM; conservative fallback."""
    try:
        cap = int(pltpu.get_tpu_info().vmem_capacity_bytes)
    except Exception:
        cap = 32 * 1024 * 1024  # safe on v5e/v6e/v7x even if the query fails
    return (cap * 3) // 4


def _per_row_bytes(Ip, Hp, Op, x_itemsize, out_itemsize):
    """VMEM bytes per batch row of the tile, including all kernel temporaries."""
    return (2 * Ip * x_itemsize      # double-buffered x tile
            + 2 * Ip                 # bf16 cast of x
            + 4 * Hp + 2 * Hp        # f32 hidden activation + its bf16 cast
            + 4 * Op                 # f32 out before the final cast
            + 2 * Op * out_itemsize)  # double-buffered out tile


def _weight_bytes(Ip, Hp, Op, buffered_once):
    w = (Ip * Hp + Hp * Op) * 2 + (Hp + Op) * 4  # bf16 weights + f32 biases
    return w if buffered_once else 2 * w         # Pallas double-buffers by default


def _choose_block_b(B, Ip, Hp, Op, x_itemsize, out_itemsize, budget):
    """Largest batch tile (multiple of 8) that fits the VMEM budget,
    divides the 8-aligned batch, and keeps >= 2 grid steps (v7x megacore)."""
    Bp8 = _round_up(B, 8)
    avail = budget - _weight_bytes(Ip, Hp, Op, buffered_once=True) - (2 << 20)
    per_row = _per_row_bytes(Ip, Hp, Op, x_itemsize, out_itemsize)
    tb = avail // max(per_row, 1)
    tb = int(max(8, min(tb, 8192)))
    tb = min(tb, Bp8)
    if Bp8 >= 16:
        # keep at least 2 grid steps so the "parallel" axis can feed both
        # TensorCores on v7x (harmless ~0.35us extra step on v5e/v6e)
        tb = min(tb, Bp8 // 2)
    tb = max((tb // 8) * 8, 8)
    while Bp8 % tb != 0:  # prefer a TB that divides Bp8 -> no extra row padding
        tb -= 8
    return max(tb, 8)


# ---------------------------------------------------------------------------
# Parameters: init (torch-like) + one-time pad/cast (hoisted out of forward)
# ---------------------------------------------------------------------------
def init_tower_params(key, input_size, hidden_size, output_size, dtype=jnp.float32):
    """Deterministic init mimicking torch.nn.Linear defaults (U(+/- 1/sqrt(fan_in)))."""
    k1, k2, k3, k4 = jax.random.split(key, 4)
    lim1 = 1.0 / jnp.sqrt(input_size)
    lim2 = 1.0 / jnp.sqrt(hidden_size)
    # stored already transposed: [in_features, out_features]
    w1 = jax.random.uniform(k1, (input_size, hidden_size), dtype, -lim1, lim1)
    b1 = jax.random.uniform(k2, (1, hidden_size), dtype, -lim1, lim1)
    w2 = jax.random.uniform(k3, (hidden_size, output_size), dtype, -lim2, lim2)
    b2 = jax.random.uniform(k4, (1, output_size), dtype, -lim2, lim2)
    return w1, b1, w2, b2


def prepare_tower_params(w1, b1, w2, b2, pad_to=128):
    """One-time cast to bf16 + zero-pad of I/H/O to multiples of `pad_to`.

    Done once at init so the steady-state forward pays no per-call HBM pass
    over the weights.  (On v6e/v7x pad_to=256 matches the 256x256 MXU; 128 is
    correct everywhere and avoids blowing up tiny layers.)
    """
    I, H = w1.shape
    O = w2.shape[1]
    Ip, Hp, Op = _round_up(I, pad_to), _round_up(H, pad_to), _round_up(O, pad_to)
    w1p = jnp.pad(w1.astype(jnp.bfloat16), ((0, Ip - I), (0, Hp - H)))
    b1p = jnp.pad(b1.reshape(1, -1).astype(jnp.float32), ((0, 0), (0, Hp - H)))
    w2p = jnp.pad(w2.astype(jnp.bfloat16), ((0, Hp - H), (0, Op - O)))
    b2p = jnp.pad(b2.reshape(1, -1).astype(jnp.float32), ((0, 0), (0, Op - O)))
    return {"w1": w1p, "b1": b1p, "w2": w2p, "b2": b2p,
            "dims": (I, H, O, Ip, Hp, Op)}


# ---------------------------------------------------------------------------
# pallas_call builder + forward
# ---------------------------------------------------------------------------
def _make_tower_call(Bp, TB, Ip, Hp, Op, out_dtype, buffer_weights, vmem_limit, cost):
    # Resident weights/biases: constant block index; single-buffer them so
    # they don't pay the default 2x pipelining cost.
    wkw = {"pipeline_mode": pl.Buffered(1)} if buffer_weights else {}
    return pl.pallas_call(
        tower_kernel,
        out_shape=jax.ShapeDtypeStruct((Bp, Op), out_dtype),
        grid_spec=pltpu.PrefetchScalarGridSpec(
            num_scalar_prefetch=0,
            grid=(Bp // TB,),
            in_specs=[
                pl.BlockSpec((TB, Ip), lambda i: (i, 0)),          # x tile, pipelined
                pl.BlockSpec((Ip, Hp), lambda i: (0, 0), **wkw),   # w1 resident
                pl.BlockSpec((1, Hp), lambda i: (0, 0), **wkw),    # b1 resident
                pl.BlockSpec((Hp, Op), lambda i: (0, 0), **wkw),   # w2 resident
                pl.BlockSpec((1, Op), lambda i: (0, 0), **wkw),    # b2 resident
            ],
            out_specs=pl.BlockSpec((TB, Op), lambda i: (i, 0)),    # lane-dense store
        ),
        compiler_params=pltpu.CompilerParams(
            dimension_semantics=("parallel",),   # v7x: shard batch across 2 TCs
            vmem_limit_bytes=int(vmem_limit),
        ),
        cost_estimate=cost,
    )


def tower_forward(x, params):
    """x: [B, I]; params from prepare_tower_params -> [B, O]."""
    I, H, O, Ip, Hp, Op = params["dims"]
    B = x.shape[0]
    assert x.shape[1] == I, (x.shape, I)

    xsz = jnp.dtype(x.dtype).itemsize
    osz = xsz

    budget = _vmem_budget_bytes()
    TB = _choose_block_b(B, Ip, Hp, Op, xsz, osz, budget)
    Bp = _round_up(B, 8)  # TB divides Bp by construction

    # Pad batch rows to the 8-row sublane minimum and the contraction dim to
    # 128 lanes (dense x vregs, full MXU K tiles).  For producers that already
    # emit 128-aligned features this pad is a no-op.
    if (Bp, Ip) != (B, I):
        xp = jnp.pad(x, ((0, Bp - B), (0, Ip - I)))
    else:
        xp = x

    cost = pl.CostEstimate(
        flops=2 * Bp * (Ip * Hp + Hp * Op),
        transcendentals=Bp * Op,
        bytes_accessed=(Bp * Ip * xsz
                        + (Ip * Hp + Hp * Op) * 2 + (Hp + Op) * 4
                        + Bp * Op * osz),
    )

    args = (xp, params["w1"], params["b1"], params["w2"], params["b2"])
    try:
        out = _make_tower_call(Bp, TB, Ip, Hp, Op, x.dtype, True, budget, cost)(*args)
    except Exception:
        # Fallback if this JAX version rejects pipeline_mode=Buffered(1).
        out = _make_tower_call(Bp, TB, Ip, Hp, Op, x.dtype, False, budget, cost)(*args)

    # Note: downstream consumers that can accept the (Bp, Op) padded layout
    # should take `out` directly and skip this slice (saves an HBM pass).
    return out[:B, :O]


# ---------------------------------------------------------------------------
# Demo / correctness check
# ---------------------------------------------------------------------------
if __name__ == "__main__":
    key = jax.random.PRNGKey(0)
    k_x, k_p = jax.random.split(key)

    batch, input_size, hidden_size, output_size = 8, 32, 64, 16
    x = jax.random.normal(k_x, (batch, input_size), jnp.float32)
    w1, b1, w2, b2 = init_tower_params(k_p, input_size, hidden_size, output_size)
    params = prepare_tower_params(w1, b1, w2, b2)  # one-time pad/cast

    out = tower_forward(x, params)
    out = jax.block_until_ready(out)

    # Plain-JAX reference with the same bf16-matmul / f32-epilogue recipe.
    h_ref = jnp.dot(x.astype(jnp.bfloat16), w1.astype(jnp.bfloat16),
                    preferred_element_type=jnp.float32) + b1
    h_ref = jnp.maximum(h_ref, 0.0)
    o_ref = jnp.dot(h_ref.astype(jnp.bfloat16), w2.astype(jnp.bfloat16),
                    preferred_element_type=jnp.float32) + b2
    ref = jax.nn.sigmoid(o_ref)

    assert out.shape == (batch, output_size)
    assert jnp.allclose(out, ref, atol=2e-3, rtol=0.0), (
        f"max abs diff {jnp.max(jnp.abs(out - ref))}")

    print("KERNEL_OK")
</pallas_src>

<mosaic_0001>
module attributes {stable_mosaic.version = 11 : i64} {
  func.func @tower_kernel(%arg0: i32, %arg1: memref<8x128xf32, #tpu.memory_space<vmem>>, %arg2: memref<128x128xbf16, #tpu.memory_space<vmem>>, %arg3: memref<1x128xf32, #tpu.memory_space<vmem>>, %arg4: memref<128x128xbf16, #tpu.memory_space<vmem>>, %arg5: memref<1x128xf32, #tpu.memory_space<vmem>>, %arg6: memref<8x128xf32, #tpu.memory_space<vmem>>) attributes {dimension_semantics = [#tpu.dimension_semantics<parallel>], iteration_bounds = array<i64: 1>, scalar_prefetch = 0 : i64, scratch_operands = 0 : i64, tpu.core_type = #tpu.core_type<tc>, window_params = [{transform_indices = @transform_0, window_bounds = array<i64: 8, 128>}, {pipeline_mode = #tpu.pipeline_mode<synchronous>, transform_indices = @transform_1, window_bounds = array<i64: 128, 128>}, {pipeline_mode = #tpu.pipeline_mode<synchronous>, transform_indices = @transform_2, window_bounds = array<i64: 1, 128>}, {pipeline_mode = #tpu.pipeline_mode<synchronous>, transform_indices = @transform_3, window_bounds = array<i64: 128, 128>}, {pipeline_mode = #tpu.pipeline_mode<synchronous>, transform_indices = @transform_4, window_bounds = array<i64: 1, 128>}, {transform_indices = @transform_5, window_bounds = array<i64: 8, 128>}]} {
    %c0 = arith.constant 0 : index
    %c0_0 = arith.constant 0 : index
    %0 = vector.load %arg1[%c0, %c0_0] : memref<8x128xf32, #tpu.memory_space<vmem>>, vector<8x128xf32>
    %1 = arith.truncf %0 : vector<8x128xf32> to vector<8x128xbf16>
    %c0_1 = arith.constant 0 : index
    %c0_2 = arith.constant 0 : index
    %2 = vector.load %arg2[%c0_1, %c0_2] : memref<128x128xbf16, #tpu.memory_space<vmem>>, vector<128x128xbf16>
    %cst = arith.constant dense<0.000000e+00> : vector<8x128xf32>
    %3 = tpu.matmul %1, %2, %cst {dimension_numbers = #tpu.dot_dimension_numbers<[1], [0], [0], [1], [0, 0, 1, 1], [], []>} : vector<8x128xbf16>, vector<128x128xbf16>, vector<8x128xf32> -> vector<8x128xf32>
    %c0_3 = arith.constant 0 : index
    %c0_4 = arith.constant 0 : index
    %4 = vector.load %arg3[%c0_3, %c0_4] : memref<1x128xf32, #tpu.memory_space<vmem>>, vector<1x128xf32>
    %5 = vector.broadcast %4 : vector<1x128xf32> to vector<8x128xf32>
    %6 = arith.addf %3, %5 : vector<8x128xf32>
    %cst_5 = arith.constant 0.000000e+00 : f32
    %7 = vector.broadcast %cst_5 : f32 to vector<8x128xf32>
    %8 = arith.maximumf %6, %7 : vector<8x128xf32>
    %9 = arith.truncf %8 : vector<8x128xf32> to vector<8x128xbf16>
    %c0_6 = arith.constant 0 : index
    %c0_7 = arith.constant 0 : index
    %10 = vector.load %arg4[%c0_6, %c0_7] : memref<128x128xbf16, #tpu.memory_space<vmem>>, vector<128x128xbf16>
    %cst_8 = arith.constant dense<0.000000e+00> : vector<8x128xf32>
    %11 = tpu.matmul %9, %10, %cst_8 {dimension_numbers = #tpu.dot_dimension_numbers<[1], [0], [0], [1], [0, 0, 1, 1], [], []>} : vector<8x128xbf16>, vector<128x128xbf16>, vector<8x128xf32> -> vector<8x128xf32>
    %c0_9 = arith.constant 0 : index
    %c0_10 = arith.constant 0 : index
    %12 = vector.load %arg5[%c0_9, %c0_10] : memref<1x128xf32, #tpu.memory_space<vmem>>, vector<1x128xf32>
    %13 = vector.broadcast %12 : vector<1x128xf32> to vector<8x128xf32>
    %14 = arith.addf %11, %13 : vector<8x128xf32>
    %cst_11 = arith.constant 5.000000e-01 : f32
    %15 = vector.broadcast %cst_11 : f32 to vector<8x128xf32>
    %16 = arith.mulf %15, %14 : vector<8x128xf32>
    %17 = math.tanh %16 : vector<8x128xf32>
    %cst_12 = arith.constant 5.000000e-01 : f32
    %18 = vector.broadcast %cst_12 : f32 to vector<8x128xf32>
    %19 = arith.mulf %18, %17 : vector<8x128xf32>
    %cst_13 = arith.constant 5.000000e-01 : f32
    %20 = vector.broadcast %cst_13 : f32 to vector<8x128xf32>
    %21 = arith.addf %19, %20 : vector<8x128xf32>
    %c0_14 = arith.constant 0 : index
    %c0_15 = arith.constant 0 : index
    %22 = vector.load %arg6[%c0_14, %c0_15] : memref<8x128xf32, #tpu.memory_space<vmem>>, vector<8x128xf32>
    tpu.vector_store %arg6[%c0_14, %c0_15], %21 {strides = array<i32>} : memref<8x128xf32, #tpu.memory_space<vmem>>, vector<8x128xf32>,
    return
  }
  func.func @transform_0(%arg0: i32) -> (i32, i32) {
    %c0_i32 = arith.constant 0 : i32
    %c0_i32_0 = arith.constant 0 : i32
    return %arg0, %c0_i32 : i32, i32
  }
  func.func @transform_1(%arg0: i32) -> (i32, i32) {
    %c0_i32 = arith.constant 0 : i32
    %c0_i32_0 = arith.constant 0 : i32
    %c0_i32_1 = arith.constant 0 : i32
    return %c0_i32, %c0_i32_0 : i32, i32
  }
  func.func @transform_2(%arg0: i32) -> (i32, i32) {
    %c0_i32 = arith.constant 0 : i32
    %c0_i32_0 = arith.constant 0 : i32
    %c0_i32_1 = arith.constant 0 : i32
    return %c0_i32, %c0_i32_0 : i32, i32
  }
  func.func @transform_3(%arg0: i32) -> (i32, i32) {
    %c0_i32 = arith.constant 0 : i32
    %c0_i32_0 = arith.constant 0 : i32
    %c0_i32_1 = arith.constant 0 : i32
    return %c0_i32, %c0_i32_0 : i32, i32
  }
  func.func @transform_4(%arg0: i32) -> (i32, i32) {
    %c0_i32 = arith.constant 0 : i32
    %c0_i32_0 = arith.constant 0 : i32
    %c0_i32_1 = arith.constant 0 : i32
    return %c0_i32, %c0_i32_0 : i32, i32
  }
  func.func @transform_5(%arg0: i32) -> (i32, i32) {
    %c0_i32 = arith.constant 0 : i32
    %c0_i32_0 = arith.constant 0 : i32
    return %arg0, %c0_i32 : i32, i32
  }
}

module attributes {stable_mosaic.version = 11 : i64} {
  func.func @tower_kernel(%arg0: i32, %arg1: memref<8x128xf32, #tpu.memory_space<vmem>>, %arg2: memref<128x128xbf16, #tpu.memory_space<vmem>>, %arg3: memref<1x128xf32, #tpu.memory_space<vmem>>, %arg4: memref<128x128xbf16, #tpu.memory_space<vmem>>, %arg5: memref<1x128xf32, #tpu.memory_space<vmem>>, %arg6: memref<8x128xf32, #tpu.memory_space<vmem>>) attributes {dimension_semantics = [#tpu.dimension_semantics<parallel>], iteration_bounds = array<i64: 1>, scalar_prefetch = 0 : i64, scratch_operands = 0 : i64, tpu.core_type = #tpu.core_type<tc>, window_params = [{transform_indices = @transform_0, window_bounds = array<i64: 8, 128>}, {pipeline_mode = #tpu.pipeline_mode<synchronous>, transform_indices = @transform_1, window_bounds = array<i64: 128, 128>}, {pipeline_mode = #tpu.pipeline_mode<synchronous>, transform_indices = @transform_2, window_bounds = array<i64: 1, 128>}, {pipeline_mode = #tpu.pipeline_mode<synchronous>, transform_indices = @transform_3, window_bounds = array<i64: 128, 128>}, {pipeline_mode = #tpu.pipeline_mode<synchronous>, transform_indices = @transform_4, window_bounds = array<i64: 1, 128>}, {transform_indices = @transform_5, window_bounds = array<i64: 8, 128>}]} {
    %c0 = arith.constant 0 : index
    %c0_0 = arith.constant 0 : index
    %0 = vector.load %arg1[%c0, %c0_0] : memref<8x128xf32, #tpu.memory_space<vmem>>, vector<8x128xf32>
    %1 = arith.truncf %0 : vector<8x128xf32> to vector<8x128xbf16>
    %c0_1 = arith.constant 0 : index
    %c0_2 = arith.constant 0 : index
    %2 = vector.load %arg2[%c0_1, %c0_2] : memref<128x128xbf16, #tpu.memory_space<vmem>>, vector<128x128xbf16>
    %cst = arith.constant dense<0.000000e+00> : vector<8x128xf32>
    %3 = tpu.matmul %1, %2, %cst {dimension_numbers = #tpu.dot_dimension_numbers<[1], [0], [0], [1], [0, 0, 1, 1], [], []>} : vector<8x128xbf16>, vector<128x128xbf16>, vector<8x128xf32> -> vector<8x128xf32>
    %c0_3 = arith.constant 0 : index
    %c0_4 = arith.constant 0 : index
    %4 = vector.load %arg3[%c0_3, %c0_4] : memref<1x128xf32, #tpu.memory_space<vmem>>, vector<1x128xf32>
    %5 = vector.broadcast %4 : vector<1x128xf32> to vector<8x128xf32>
    %6 = arith.addf %3, %5 : vector<8x128xf32>
    %cst_5 = arith.constant 0.000000e+00 : f32
    %7 = vector.broadcast %cst_5 : f32 to vector<8x128xf32>
    %8 = arith.maximumf %6, %7 : vector<8x128xf32>
    %9 = arith.truncf %8 : vector<8x128xf32> to vector<8x128xbf16>
    %c0_6 = arith.constant 0 : index
    %c0_7 = arith.constant 0 : index
    %10 = vector.load %arg4[%c0_6, %c0_7] : memref<128x128xbf16, #tpu.memory_space<vmem>>, vector<128x128xbf16>
    %cst_8 = arith.constant dense<0.000000e+00> : vector<8x128xf32>
    %11 = tpu.matmul %9, %10, %cst_8 {dimension_numbers = #tpu.dot_dimension_numbers<[1], [0], [0], [1], [0, 0, 1, 1], [], []>} : vector<8x128xbf16>, vector<128x128xbf16>, vector<8x128xf32> -> vector<8x128xf32>
    %c0_9 = arith.constant 0 : index
    %c0_10 = arith.constant 0 : index
    %12 = vector.load %arg5[%c0_9, %c0_10] : memref<1x128xf32, #tpu.memory_space<vmem>>, vector<1x128xf32>
    %13 = vector.broadcast %12 : vector<1x128xf32> to vector<8x128xf32>
    %14 = arith.addf %11, %13 : vector<8x128xf32>
    %cst_11 = arith.constant 5.000000e-01 : f32
    %15 = vector.broadcast %cst_11 : f32 to vector<8x128xf32>
    %16 = arith.mulf %15, %14 : vector<8x128xf32>
    %17 = math.tanh %16 : vector<8x128xf32>
    %cst_12 = arith.constant 5.000000e-01 : f32
    %18 = vector.broadcast %cst_12 : f32 to vector<8x128xf32>
    %19 = arith.mulf %18, %17 : vector<8x128xf32>
    %cst_13 = arith.constant 5.000000e-01 : f32
    %20 = vector.broadcast %cst_13 : f32 to vector<8x128xf32>
    %21 = arith.addf %19, %20 : vector<8x128xf32>
    %c0_14 = arith.constant 0 : index
    %c0_15 = arith.constant 0 : index
    %22 = vector.load %arg6[%c0_14, %c0_15] : memref<8x128xf32, #tpu.memory_space<vmem>>, vector<8x128xf32>
    tpu.vector_store %arg6[%c0_14, %c0_15], %21 {strides = array<i32>} : memref<8x128xf32, #tpu.memory_space<vmem>>, vector<8x128xf32>,
    return
  }
  func.func @transform_0(%arg0: i32) -> (i32, i32) {
    %c0_i32 = arith.constant 0 : i32
    %c0_i32_0 = arith.constant 0 : i32
    return %arg0, %c0_i32 : i32, i32
  }
  func.func @transform_1(%arg0: i32) -> (i32, i32) {
    %c0_i32 = arith.constant 0 : i32
    %c0_i32_0 = arith.constant 0 : i32
    %c0_i32_1 = arith.constant 0 : i32
    return %c0_i32, %c0_i32_0 : i32, i32
  }
  func.func @transform_2(%arg0: i32) -> (i32, i32) {
    %c0_i32 = arith.constant 0 : i32
    %c0_i32_0 = arith.constant 0 : i32
    %c0_i32_1 = arith.constant 0 : i32
    return %c0_i32, %c0_i32_0 : i32, i32
  }
  func.func @transform_3(%arg0: i32) -> (i32, i32) {
    %c0_i32 = arith.constant 0 : i32
    %c0_i32_0 = arith.constant 0 : i32
    %c0_i32_1 = arith.constant 0 : i32
    return %c0_i32, %c0_i32_0 : i32, i32
  }
  func.func @transform_4(%arg0: i32) -> (i32, i32) {
    %c0_i32 = arith.constant 0 : i32
    %c0_i32_0 = arith.constant 0 : i32
    %c0_i32_1 = arith.constant 0 : i32
    return %c0_i32, %c0_i32_0 : i32, i32
  }
  func.func @transform_5(%arg0: i32) -> (i32, i32) {
    %c0_i32 = arith.constant 0 : i32
    %c0_i32_0 = arith.constant 0 : i32
    return %arg0, %c0_i32 : i32, i32
  }
}

</mosaic_0001>

<bundles_post_ra>
// kernel: tpu_custom_call.1
= control target key start
LH: loop header
LB: loop body
LE: loop exit
PB: predicated region body
PF: predicated region fallthrough
CT: control target
= control target key end

     0   :  { %10 = vsyncpa [#allocation3], 0  ;;  %s501_s0 = inlined_call_operand.hbm [shape: f32[8,128], index: 0, kind: input, shape index: {}]   ;;  %s502_s1 = inlined_call_operand.hbm [shape: bf16[128,128], index: 1, kind: input, shape index: {}]   ;;  %s503_s2 = inlined_call_operand.vmem [shape: f32[1,128], index: 2, kind: input, shape index: {}]   ;;  %s504_s3 = inlined_call_operand.hbm [shape: bf16[128,128], index: 3, kind: input, shape index: {}]   ;;  %s505_s4 = inlined_call_operand.vmem [shape: f32[1,128], index: 4, kind: input, shape index: {}]   ;;  %s506_s5 = inlined_call_operand.hbm [shape: f32[8,128], index: 5, kind: output, shape index: {}]  }
   0x1   :  { %11 = vsyncpa [#allocation6], 0  ;;  %s28_s20 = sshll.u32 %s502_s1, 4  ;;  %s29_s20 = int_to_ptr.hbm [resolvable:$true] %s28_s20 }
   0x2   :  { %12 = vsyncpa [#allocation4], 0  ;;  %s447_s21 = smov [#allocation5]   ;;  %s18_s25 = sshll.u32 %s501_s0, 4  ;;  %s19_s25 = int_to_ptr.hbm [resolvable:$true] %s18_s25 }
   0x3   :  { %s30_s22 = sshll.u32 %s447_s21, 4  ;;  %s448_s26 = smov 64   ;;  %s31_s22 = int_to_ptr.vmem [resolvable:$true] %s30_s22 }
   0x4   :  { %s449_s27 = smov 4   ;;  %s450_s28 = smov [#allocation2]  }
   0x5   :  { %36 = dma.hbm_to_vmem [thread:$0]  %s29_s20, 1024, %s31_s22, [#allocation6], %s448_s26, %s448_s26, %s449_s27  }
   0x6   :  { %s20_s29 = sshll.u32 %s450_s28, 4  ;;  %s43_s7 = sshll.u32 %s504_s3, 4  ;;  %s21_s29 = int_to_ptr.vmem [resolvable:$true] %s20_s29  ;;  %s44_s7 = int_to_ptr.hbm [resolvable:$true] %s43_s7 }
   0x7   :  { %23 = dma.hbm_to_vmem [thread:$0]  %s19_s25, 128, %s21_s29, [#allocation3]  }
   0x8   :  { %s451_s1 = smov [#allocation7]  }
   0x9   :  { %s45_s8 = sshll.u32 %s451_s1, 4  ;;  %s46_s8 = int_to_ptr.vmem [resolvable:$true] %s45_s8 }
   0xa   :  { %51 = dma.hbm_to_vmem [thread:$0]  %s44_s7, 1024, %s46_s8, [#allocation6], %s448_s26, %s448_s26, %s449_s27  }
   0xb   :  { %441 = dma.done.wait [#allocation3], 128  }
   0xc   :  { %442 = vsyncadd [#allocation3], 4294967168 }
   0xd   :  { %443 = dma.done.wait [#allocation6], 2048  }
   0xe   :  { %444 = vsyncadd [#allocation6], 4294965248  ;;  %v326_v0 = vld [vmem:[#allocation5 + $0x38] sm:$0xff]  ;;  %v325_v1 = vld [vmem:[#allocation5 + $0x30] sm:$0xff]  ;;  %s452_s11 = smov [#allocation8]   ;;  %s244_s14 = sshll.u32 %s506_s5, 4  ;;  %s245_s14 = int_to_ptr.hbm [resolvable:$true] %s244_s14 }
   0xf   :  { %136 = vmatpush.bf16.msra.mxu0 %v326_v0  ;;  %v334_v2 = vld [vmem:[#allocation7 + $0x38] sm:$0xff]  ;;  %v333_v3 = vld [vmem:[#allocation7 + $0x30] sm:$0xff]  ;;  %v324_v4 = vld [vmem:[#allocation5 + $0x28] sm:$0xff]  ;;  %s242_s12 = sshll.u32 %s452_s11, 4  ;;  %s243_s12 = int_to_ptr.vmem [resolvable:$true] %s242_s12 }
  0x10   :  { %219 = vmatpush.bf16.msra.mxu1 %v334_v2  ;;  %v332_v5 = vld [vmem:[#allocation7 + $0x28] sm:$0xff]  ;;  %v323_v6 = vld [vmem:[#allocation5 + $0x20] sm:$0xff]  ;;  %v322_v8 = vld [vmem:[#allocation5 + $0x18] sm:$0xff] }
  0x11   :  { %v331_v7 = vld [vmem:[#allocation7 + $0x20] sm:$0xff]  ;;  %v330_v9 = vld [vmem:[#allocation7 + $0x18] sm:$0xff]  ;;  %v321_v10 = vld [vmem:[#allocation5 + $0x10] sm:$0xff] }
  0x12   :  { %v329_v11 = vld [vmem:[#allocation7 + $0x10] sm:$0xff]  ;;  %v320_v12 = vld [vmem:[#allocation5 + $0x8] sm:$0xff]  ;;  %v319_v13 = vld [vmem:[#allocation5] sm:$0xff] }
  0x13   :  { %137 = vmatpush.bf16.msra.mxu0 %v325_v1  ;;  %v66_v14 = vld [vmem:[#allocation2] sm:$0xff]  ;;  %v328_v16 = vld [vmem:[#allocation7 + $0x8] sm:$0xff]  ;;  %v327_v17 = vld [vmem:[#allocation7] sm:$0xff] }
  0x14   :  { %220 = vmatpush.bf16.msra.mxu1 %v333_v3  ;;  %v67_v15 = vpack.c.bf16 %v66_v14, %v66_v14  ;;  %v341_v18 = vld [vmem:[%s503_s2] ss:$0 sm:$0xff] }
  0x15   :  { %v342_v24 = vld [vmem:[%s505_s4] ss:$0 sm:$0xff] }
  0x17   :  { %138 = vmatpush.bf16.msra.mxu0 %v324_v4 }
  0x18   :  { %221 = vmatpush.bf16.msra.mxu1 %v332_v5 }
  0x1b   :  { %139 = vmatpush.bf16.msra.mxu0 %v323_v6 }
  0x1c   :  { %222 = vmatpush.bf16.msra.mxu1 %v331_v7 }
  0x1f   :  { %140 = vmatpush.bf16.msra.mxu0 %v322_v8 }
  0x20   :  { %223 = vmatpush.bf16.msra.mxu1 %v330_v9 }
  0x23   :  { %141 = vmatpush.bf16.msra.mxu0 %v321_v10 }
  0x24   :  { %224 = vmatpush.bf16.msra.mxu1 %v329_v11 }
  0x27   :  { %142 = vmatpush.bf16.msra.mxu0 %v320_v12 }
  0x28   :  { %225 = vmatpush.bf16.msra.mxu1 %v328_v16 }
  0x2b   :  { %143 = vmatpush.bf16.msra.mxu0 %v319_v13 }
  0x2c   :  { %226 = vmatpush.bf16.msra.mxu1 %v327_v17 }
  0x2e   :  { %144 = vmatmul.bf16.vlgmr.msra.gmra.mxu0 %v67_v15 }
  0xab   :  { %v145_v19 = vpop.f32.mrf.mxu0 }
  0xac   :  { %v146_v20 = vadd.f32 %v341_v18, %v145_v19 }
  0xae   :  { %v149_v21 = vmax.f32 %v146_v20, 0.0 }
  0xb0   :  { %v150_v22 = vpack.c.bf16 %v149_v21, %v149_v21 }
  0xb2   :  { %227 = vmatmul.bf16.vlgmr.msra.gmra.mxu1 %v150_v22 }
  0xb3   :  { %v147_v23 = vpop.f32.mrf.mxu0 }
 0x12f   :  { %v228_v25 = vpop.f32.mrf.mxu1 }
 0x130   :  { %v229_v26 = vadd.f32 %v342_v24, %v228_v25 }
 0x132   :  { %v232_v27 = vmul.f32 0.5, %v229_v26 }
 0x134   :  { %343 = vtanh.f32 %v232_v27 }
 0x137   :  { %v230_v28 = vpop.f32.mrf.mxu1 }
 0x13a   :  { %v344_v29 = vpop.eup %343 }
 0x13b   :  { %v234_v30 = vmul.f32 0.5, %v344_v29 }
 0x13d   :  { %v235_v31 = vadd.f32 0.5, %v234_v30 }
 0x13f   :  { %236 = vst [vmem:[#allocation8] sm:$0xff] %v235_v31 }
 0x140   :  { %247 = dma.vmem_to_hbm [thread:$0]  %s243_s12, 128, %s245_s14, [#allocation4]  }
 0x141   :  { %445 = dma.done.wait [#allocation4], 128  }
 0x142   :  { %446 = vsyncadd [#allocation4], 4294967168 }
 0x143   :  { %252 = vsyncpa [#allocation3], 1 }
 0x144   :  { %253 = vsyncpa [#allocation6], 1 }
 0x145   :  { %254 = vsyncpa [#allocation4], 1 }

// kernel: tpu_custom_call.1
= control target key start
LH: loop header
LB: loop body
LE: loop exit
PB: predicated region body
PF: predicated region fallthrough
CT: control target
= control target key end

     0   :  { %10 = vsyncpa [#allocation3], 0  ;;  %s501_s0 = inlined_call_operand.hbm [shape: f32[8,128], index: 0, kind: input, shape index: {}]   ;;  %s502_s1 = inlined_call_operand.hbm [shape: bf16[128,128], index: 1, kind: input, shape index: {}]   ;;  %s503_s2 = inlined_call_operand.vmem [shape: f32[1,128], index: 2, kind: input, shape index: {}]   ;;  %s504_s3 = inlined_call_operand.hbm [shape: bf16[128,128], index: 3, kind: input, shape index: {}]   ;;  %s505_s4 = inlined_call_operand.vmem [shape: f32[1,128], index: 4, kind: input, shape index: {}]   ;;  %s506_s5 = inlined_call_operand.hbm [shape: f32[8,128], index: 5, kind: output, shape index: {}]  }
   0x1   :  { %11 = vsyncpa [#allocation6], 0  ;;  %s28_s20 = sshll.u32 %s502_s1, 4  ;;  %s29_s20 = int_to_ptr.hbm [resolvable:$true] %s28_s20 }
   0x2   :  { %12 = vsyncpa [#allocation4], 0  ;;  %s447_s21 = smov [#allocation5]   ;;  %s18_s25 = sshll.u32 %s501_s0, 4  ;;  %s19_s25 = int_to_ptr.hbm [resolvable:$true] %s18_s25 }
   0x3   :  { %s30_s22 = sshll.u32 %s447_s21, 4  ;;  %s448_s26 = smov 64   ;;  %s31_s22 = int_to_ptr.vmem [resolvable:$true] %s30_s22 }
   0x4   :  { %s449_s27 = smov 4   ;;  %s450_s28 = smov [#allocation2]  }
   0x5   :  { %36 = dma.hbm_to_vmem [thread:$0]  %s29_s20, 1024, %s31_s22, [#allocation6], %s448_s26, %s448_s26, %s449_s27  }
   0x6   :  { %s20_s29 = sshll.u32 %s450_s28, 4  ;;  %s43_s7 = sshll.u32 %s504_s3, 4  ;;  %s21_s29 = int_to_ptr.vmem [resolvable:$true] %s20_s29  ;;  %s44_s7 = int_to_ptr.hbm [resolvable:$true] %s43_s7 }
   0x7   :  { %23 = dma.hbm_to_vmem [thread:$0]  %s19_s25, 128, %s21_s29, [#allocation3]  }
   0x8   :  { %s451_s1 = smov [#allocation7]  }
   0x9   :  { %s45_s8 = sshll.u32 %s451_s1, 4  ;;  %s46_s8 = int_to_ptr.vmem [resolvable:$true] %s45_s8 }
   0xa   :  { %51 = dma.hbm_to_vmem [thread:$0]  %s44_s7, 1024, %s46_s8, [#allocation6], %s448_s26, %s448_s26, %s449_s27  }
   0xb   :  { %441 = dma.done.wait [#allocation3], 128  }
   0xc   :  { %442 = vsyncadd [#allocation3], 4294967168 }
   0xd   :  { %443 = dma.done.wait [#allocation6], 2048  }
   0xe   :  { %444 = vsyncadd [#allocation6], 4294965248  ;;  %v326_v0 = vld [vmem:[#allocation5 + $0x38] sm:$0xff]  ;;  %v325_v1 = vld [vmem:[#allocation5 + $0x30] sm:$0xff]  ;;  %s452_s11 = smov [#allocation8]   ;;  %s244_s14 = sshll.u32 %s506_s5, 4  ;;  %s245_s14 = int_to_ptr.hbm [resolvable:$true] %s244_s14 }
   0xf   :  { %136 = vmatpush.bf16.msra.mxu0 %v326_v0  ;;  %v334_v2 = vld [vmem:[#allocation7 + $0x38] sm:$0xff]  ;;  %v333_v3 = vld [vmem:[#allocation7 + $0x30] sm:$0xff]  ;;  %v324_v4 = vld [vmem:[#allocation5 + $0x28] sm:$0xff]  ;;  %s242_s12 = sshll.u32 %s452_s11, 4  ;;  %s243_s12 = int_to_ptr.vmem [resolvable:$true] %s242_s12 }
  0x10   :  { %219 = vmatpush.bf16.msra.mxu1 %v334_v2  ;;  %v332_v5 = vld [vmem:[#allocation7 + $0x28] sm:$0xff]  ;;  %v323_v6 = vld [vmem:[#allocation5 + $0x20] sm:$0xff]  ;;  %v322_v8 = vld [vmem:[#allocation5 + $0x18] sm:$0xff] }
  0x11   :  { %v331_v7 = vld [vmem:[#allocation7 + $0x20] sm:$0xff]  ;;  %v330_v9 = vld [vmem:[#allocation7 + $0x18] sm:$0xff]  ;;  %v321_v10 = vld [vmem:[#allocation5 + $0x10] sm:$0xff] }
  0x12   :  { %v329_v11 = vld [vmem:[#allocation7 + $0x10] sm:$0xff]  ;;  %v320_v12 = vld [vmem:[#allocation5 + $0x8] sm:$0xff]  ;;  %v319_v13 = vld [vmem:[#allocation5] sm:$0xff] }
  0x13   :  { %137 = vmatpush.bf16.msra.mxu0 %v325_v1  ;;  %v66_v14 = vld [vmem:[#allocation2] sm:$0xff]  ;;  %v328_v16 = vld [vmem:[#allocation7 + $0x8] sm:$0xff]  ;;  %v327_v17 = vld [vmem:[#allocation7] sm:$0xff] }
  0x14   :  { %220 = vmatpush.bf16.msra.mxu1 %v333_v3  ;;  %v67_v15 = vpack.c.bf16 %v66_v14, %v66_v14  ;;  %v341_v18 = vld [vmem:[%s503_s2] ss:$0 sm:$0xff] }
  0x15   :  { %v342_v24 = vld [vmem:[%s505_s4] ss:$0 sm:$0xff] }
  0x17   :  { %138 = vmatpush.bf16.msra.mxu0 %v324_v4 }
  0x18   :  { %221 = vmatpush.bf16.msra.mxu1 %v332_v5 }
  0x1b   :  { %139 = vmatpush.bf16.msra.mxu0 %v323_v6 }
  0x1c   :  { %222 = vmatpush.bf16.msra.mxu1 %v331_v7 }
  0x1f   :  { %140 = vmatpush.bf16.msra.mxu0 %v322_v8 }
  0x20   :  { %223 = vmatpush.bf16.msra.mxu1 %v330_v9 }
  0x23   :  { %141 = vmatpush.bf16.msra.mxu0 %v321_v10 }
  0x24   :  { %224 = vmatpush.bf16.msra.mxu1 %v329_v11 }
  0x27   :  { %142 = vmatpush.bf16.msra.mxu0 %v320_v12 }
  0x28   :  { %225 = vmatpush.bf16.msra.mxu1 %v328_v16 }
  0x2b   :  { %143 = vmatpush.bf16.msra.mxu0 %v319_v13 }
  0x2c   :  { %226 = vmatpush.bf16.msra.mxu1 %v327_v17 }
  0x2e   :  { %144 = vmatmul.bf16.vlgmr.msra.gmra.mxu0 %v67_v15 }
  0xab   :  { %v145_v19 = vpop.f32.mrf.mxu0 }
  0xac   :  { %v146_v20 = vadd.f32 %v341_v18, %v145_v19 }
  0xae   :  { %v149_v21 = vmax.f32 %v146_v20, 0.0 }
  0xb0   :  { %v150_v22 = vpack.c.bf16 %v149_v21, %v149_v21 }
  0xb2   :  { %227 = vmatmul.bf16.vlgmr.msra.gmra.mxu1 %v150_v22 }
  0xb3   :  { %v147_v23 = vpop.f32.mrf.mxu0 }
 0x12f   :  { %v228_v25 = vpop.f32.mrf.mxu1 }
 0x130   :  { %v229_v26 = vadd.f32 %v342_v24, %v228_v25 }
 0x132   :  { %v232_v27 = vmul.f32 0.5, %v229_v26 }
 0x134   :  { %343 = vtanh.f32 %v232_v27 }
 0x137   :  { %v230_v28 = vpop.f32.mrf.mxu1 }
 0x13a   :  { %v344_v29 = vpop.eup %343 }
 0x13b   :  { %v234_v30 = vmul.f32 0.5, %v344_v29 }
 0x13d   :  { %v235_v31 = vadd.f32 0.5, %v234_v30 }
 0x13f   :  { %236 = vst [vmem:[#allocation8] sm:$0xff] %v235_v31 }
 0x140   :  { %247 = dma.vmem_to_hbm [thread:$0]  %s243_s12, 128, %s245_s14, [#allocation4]  }
 0x141   :  { %445 = dma.done.wait [#allocation4], 128  }
 0x142   :  { %446 = vsyncadd [#allocation4], 4294967168 }
 0x143   :  { %252 = vsyncpa [#allocation3], 1 }
 0x144   :  { %253 = vsyncpa [#allocation6], 1 }
 0x145   :  { %254 = vsyncpa [#allocation4], 1 }

</bundles_post_ra>
